<compile_context>
chip_gen: v7x
topology: tpu7x:2x2x1
jax: 0.10.0
libtpu: 0.0.40
codegen_flags: <defaults>
</compile_context>

<pallas_src>
import math
from functools import partial

import jax
import jax.numpy as jnp
from jax.experimental import pallas as pl
from jax.experimental.pallas import tpu as pltpu


# ----------------------------------------------------------------------------
# Kernel 1: GroupNorm (one-pass stats) + qkv 1x1-conv projection
# ----------------------------------------------------------------------------
def _norm_qkv_kernel(x_ref, gamma_ref, beta_ref,
                     wq_ref, wk_ref, wv_ref, bq_ref, bk_ref, bv_ref,
                     q_ref, k_ref, v_ref, *,
                     num_groups, eps, q_scale):
    x = x_ref[0].astype(jnp.float32)                       # (C, T)
    C, T = x.shape
    gs = C // num_groups

    # One-pass per-channel sufficient statistics, folded per group (tiny arrays;
    # avoids re-laying-out / re-reading the big (C, T) slab twice).
    s1 = jnp.sum(x, axis=1, keepdims=True)                 # (C, 1)
    s2 = jnp.sum(x * x, axis=1, keepdims=True)             # (C, 1)
    g1 = jnp.sum(s1.reshape(num_groups, gs), axis=1, keepdims=True)   # (G, 1)
    g2 = jnp.sum(s2.reshape(num_groups, gs), axis=1, keepdims=True)   # (G, 1)
    n = float(gs * T)
    mean_g = g1 / n
    var_g = g2 / n - mean_g * mean_g
    rstd_g = jax.lax.rsqrt(var_g + eps)
    mean_c = jnp.broadcast_to(mean_g, (num_groups, gs)).reshape(C, 1)
    rstd_c = jnp.broadcast_to(rstd_g, (num_groups, gs)).reshape(C, 1)
    w_aff = gamma_ref[...] * rstd_c                        # (C, 1)
    b_aff = beta_ref[...] - mean_c * w_aff                 # (C, 1)
    xn = (x * w_aff + b_aff).astype(jnp.bfloat16)          # (C, T) bf16

    # 1x1 Conv1d == channel matmul; bf16 operands, fp32 accumulation on the MXU.
    q = jnp.dot(wq_ref[...], xn, preferred_element_type=jnp.float32) + bq_ref[...]
    k = jnp.dot(wk_ref[...], xn, preferred_element_type=jnp.float32) + bk_ref[...]
    v = jnp.dot(wv_ref[...], xn, preferred_element_type=jnp.float32) + bv_ref[...]

    # Legacy (q*s)·(k*s) with s = ch^-1/4  ==  scores * 1/sqrt(ch): fold once into q.
    q_ref[0] = (q * q_scale).astype(q_ref.dtype)
    k_ref[0] = k.astype(k_ref.dtype)
    v_ref[0] = v.astype(v_ref.dtype)


# ----------------------------------------------------------------------------
# Kernel 2: flash attention + zero-init proj_out + residual
# grid = (B, T//tq, num_heads, T//tk)
# ----------------------------------------------------------------------------
def _flash_proj_kernel(x_ref, q_ref, k_ref, v_ref, wpt_ref, bproj_ref,
                       o_ref, m_s, l_s, acc_s, out_s, *, num_heads):
    hid = pl.program_id(2)
    ki = pl.program_id(3)
    nk = pl.num_programs(3)

    @pl.when(jnp.logical_and(hid == 0, ki == 0))
    def _():                                   # new (batch, q-tile): zero proj acc
        out_s[...] = jnp.zeros_like(out_s)

    @pl.when(ki == 0)
    def _():                                   # new head: reset online-softmax state
        m_s[...] = jnp.full_like(m_s, -jnp.inf)
        l_s[...] = jnp.zeros_like(l_s)
        acc_s[...] = jnp.zeros_like(acc_s)

    q = q_ref[0]                               # (ch, tq) bf16, pre-scaled by 1/sqrt(ch)
    k = k_ref[0]                               # (ch, tk) bf16
    v = v_ref[0]                               # (ch, tk) bf16

    # Scores in (tk, tq) orientation: contract the head-channel axis directly on
    # the MXU (no explicit q/k transposes materialized in VMEM).
    s = jax.lax.dot_general(k, q, (((0,), (0,)), ((), ())),
                            preferred_element_type=jnp.float32)      # (tk, tq) fp32

    m_cur = jnp.max(s, axis=0, keepdims=True)                        # (1, tq)
    m_new = jnp.maximum(m_s[...], m_cur)
    alpha = jnp.exp(m_s[...] - m_new)                                # (1, tq)
    p = jnp.exp(s - m_new)                                           # (tk, tq) fp32
    l_s[...] = alpha * l_s[...] + jnp.sum(p, axis=0, keepdims=True)
    acc_s[...] = alpha * acc_s[...] + jax.lax.dot_general(
        v, p.astype(v.dtype), (((1,), (0,)), ((), ())),
        preferred_element_type=jnp.float32)                          # (ch, tq)
    m_s[...] = m_new

    @pl.when(ki == nk - 1)
    def _():                                   # head finished: fold into proj_out acc
        a_h = acc_s[...] * pl.reciprocal(l_s[...], approx=True)      # (ch, tq)
        out_s[...] += jax.lax.dot_general(
            wpt_ref[...], a_h.astype(jnp.bfloat16),
            (((0,), (0,)), ((), ())),
            preferred_element_type=jnp.float32)                      # (C, tq)

    @pl.when(jnp.logical_and(hid == num_heads - 1, ki == nk - 1))
    def _():                                   # all heads done: residual + bias
        o_ref[0] = (x_ref[0].astype(jnp.float32) + out_s[...]
                    + bproj_ref[...].astype(jnp.float32)).astype(o_ref.dtype)


def _pick_tile(T, cap):
    """Largest tile that is a multiple of 128, divides T and is <= cap; else T."""
    if T % 128 != 0:
        return T
    t = 128
    while t * 2 <= cap and T % (t * 2) == 0:
        t *= 2
    return min(t, T)


# ----------------------------------------------------------------------------
# Wrapper
# ----------------------------------------------------------------------------
def attention_block(x, params, *, num_heads, num_groups=32, eps=1e-5,
                    q_tile=512, kv_tile=512):
    gamma, beta, wqkv, bqkv, wproj, bproj = params
    B, C, H, W = x.shape
    T = H * W
    assert C % num_heads == 0 and C % num_groups == 0
    ch = C // num_heads
    assert ch % 8 == 0, "head channels must be a multiple of 8 (TPU sublane tile)"
    x3 = x.reshape(B, C, T)

    # Un-interleave the legacy [head * (q,k,v) * ch] qkv conv weight into
    # head-major q/k/v projections (bf16 MXU operands); pre-transpose proj_out so
    # each head's input-channel slice is a contiguous row block.
    w3 = wqkv.reshape(num_heads, 3, ch, C)
    b3 = bqkv.reshape(num_heads, 3, ch, 1)
    wq = w3[:, 0].reshape(C, C).astype(jnp.bfloat16)
    wk = w3[:, 1].reshape(C, C).astype(jnp.bfloat16)
    wv = w3[:, 2].reshape(C, C).astype(jnp.bfloat16)
    bq = b3[:, 0].reshape(C, 1).astype(jnp.float32)
    bk = b3[:, 1].reshape(C, 1).astype(jnp.float32)
    bv = b3[:, 2].reshape(C, 1).astype(jnp.float32)
    wpt = jnp.transpose(wproj).astype(jnp.bfloat16)          # (C_in, C_out)
    bpj = bproj.reshape(C, 1).astype(jnp.float32)
    gamma2 = gamma.reshape(C, 1).astype(jnp.float32)
    beta2 = beta.reshape(C, 1).astype(jnp.float32)

    # ---- kernel 1: GroupNorm + qkv projection (grid over batch) ----
    # NOTE: per-batch residency is O(C*T) (the O(T^2) part is tiled in kernel 2).
    norm_qkv = pl.pallas_call(
        partial(_norm_qkv_kernel, num_groups=num_groups, eps=eps,
                q_scale=1.0 / math.sqrt(ch)),
        out_shape=tuple(jax.ShapeDtypeStruct((B, C, T), jnp.bfloat16)
                        for _ in range(3)),
        grid_spec=pltpu.PrefetchScalarGridSpec(
            num_scalar_prefetch=0,
            grid=(B,),
            in_specs=[
                pl.BlockSpec((1, C, T), lambda b: (b, 0, 0)),    # x
                pl.BlockSpec((C, 1), lambda b: (0, 0)),          # gamma
                pl.BlockSpec((C, 1), lambda b: (0, 0)),          # beta
                pl.BlockSpec((C, C), lambda b: (0, 0)),          # Wq
                pl.BlockSpec((C, C), lambda b: (0, 0)),          # Wk
                pl.BlockSpec((C, C), lambda b: (0, 0)),          # Wv
                pl.BlockSpec((C, 1), lambda b: (0, 0)),          # bq
                pl.BlockSpec((C, 1), lambda b: (0, 0)),          # bk
                pl.BlockSpec((C, 1), lambda b: (0, 0)),          # bv
            ],
            out_specs=[pl.BlockSpec((1, C, T), lambda b: (b, 0, 0))
                       for _ in range(3)],
        ),
        compiler_params=pltpu.CompilerParams(
            dimension_semantics=("parallel",),
            vmem_limit_bytes=48 * 1024 * 1024),
        cost_estimate=pl.CostEstimate(
            flops=2 * B * 3 * C * C * T,
            transcendentals=B * num_groups,
            bytes_accessed=B * C * T * (4 + 3 * 2) + 3 * C * C * 2),
    )
    q_a, k_a, v_a = norm_qkv(x3, gamma2, beta2, wq, wk, wv, bq, bk, bv)

    # ---- kernel 2: flash attention + proj_out + residual ----
    tq = _pick_tile(T, q_tile)
    tk = _pick_tile(T, kv_tile)
    nq, nk = T // tq, T // tk

    flash = pl.pallas_call(
        partial(_flash_proj_kernel, num_heads=num_heads),
        out_shape=jax.ShapeDtypeStruct((B, C, T), x.dtype),
        grid_spec=pltpu.PrefetchScalarGridSpec(
            num_scalar_prefetch=0,
            grid=(B, nq, num_heads, nk),
            in_specs=[
                pl.BlockSpec((1, C, tq), lambda b, qi, h, ki: (b, 0, qi)),   # x (residual)
                pl.BlockSpec((1, ch, tq), lambda b, qi, h, ki: (b, h, qi)),  # q head slice
                pl.BlockSpec((1, ch, tk), lambda b, qi, h, ki: (b, h, ki)),  # k head slice
                pl.BlockSpec((1, ch, tk), lambda b, qi, h, ki: (b, h, ki)),  # v head slice
                pl.BlockSpec((ch, C), lambda b, qi, h, ki: (h, 0)),          # Wproj^T head rows
                pl.BlockSpec((C, 1), lambda b, qi, h, ki: (0, 0)),           # bproj
            ],
            out_specs=pl.BlockSpec((1, C, tq), lambda b, qi, h, ki: (b, 0, qi)),
            scratch_shapes=[
                pltpu.VMEM((1, tq), jnp.float32),     # running max  m
                pltpu.VMEM((1, tq), jnp.float32),     # running sum  l
                pltpu.VMEM((ch, tq), jnp.float32),    # per-head output accumulator
                pltpu.VMEM((C, tq), jnp.float32),     # proj_out accumulator
            ],
        ),
        compiler_params=pltpu.CompilerParams(
            dimension_semantics=("parallel", "parallel", "arbitrary", "arbitrary"),
            vmem_limit_bytes=48 * 1024 * 1024),
        cost_estimate=pl.CostEstimate(
            flops=4 * B * C * T * T + 2 * B * C * C * T,
            transcendentals=B * num_heads * T * T,
            bytes_accessed=B * C * T * (4 + 4) + B * C * T * 2 * (1 + 2 * nq)
                           + C * C * 2),
    )
    out = flash(x3, q_a, k_a, v_a, wpt, bpj)
    return out.reshape(B, C, H, W)


# ----------------------------------------------------------------------------
# Pure-JAX fp32 reference mirroring the PyTorch module (for verification)
# ----------------------------------------------------------------------------
def attention_block_ref(x, params, *, num_heads, num_groups=32, eps=1e-5):
    gamma, beta, wqkv, bqkv, wproj, bproj = params
    B, C, H, W = x.shape
    T = H * W
    xr = x.reshape(B, C, T)
    gs = C // num_groups
    xg = xr.reshape(B, num_groups, gs * T)
    mean = xg.mean(-1, keepdims=True)
    var = ((xg - mean) ** 2).mean(-1, keepdims=True)
    xn = ((xg - mean) / jnp.sqrt(var + eps)).reshape(B, C, T)
    xn = xn * gamma.reshape(1, C, 1) + beta.reshape(1, C, 1)
    qkv = jnp.einsum('oc,bct->bot', wqkv, xn) + bqkv.reshape(1, 3 * C, 1)
    ch = C // num_heads
    qkv = qkv.reshape(B * num_heads, 3 * ch, T)
    q, k, v = qkv[:, :ch], qkv[:, ch:2 * ch], qkv[:, 2 * ch:]
    scale = 1.0 / math.sqrt(math.sqrt(ch))
    w = jnp.einsum('bct,bcs->bts', q * scale, k * scale)
    w = jax.nn.softmax(w.astype(jnp.float32), axis=-1)
    a = jnp.einsum('bts,bcs->bct', w, v).reshape(B, C, T)
    h = jnp.einsum('oc,bct->bot', wproj, a) + bproj.reshape(1, C, 1)
    return (xr + h).reshape(B, C, H, W)


if __name__ == "__main__":
    # Small shapes consistent with the module: channels divisible by 32
    # (GroupNorm) and by num_head_channels; head channels multiple of 8.
    B, C, H, W = 2, 32, 8, 8
    num_head_channels = 8
    num_heads = C // num_head_channels   # == 4 (num_head_channels path of __init__)

    key = jax.random.PRNGKey(0)
    kx, kw, kb = jax.random.split(key, 3)
    x = jax.random.normal(kx, (B, C, H, W), dtype=jnp.float32)

    # Parameter shapes from the module's __init__:
    gamma = jnp.ones((C, 1), jnp.float32)                        # GroupNorm weight
    beta = jnp.zeros((C, 1), jnp.float32)                        # GroupNorm bias
    wqkv = 0.05 * jax.random.normal(kw, (3 * C, C), jnp.float32)  # Conv1d(C,3C,1)
    bqkv = 0.01 * jax.random.normal(kb, (3 * C, 1), jnp.float32)
    wproj_zero = jnp.zeros((C, C), jnp.float32)                  # zero_module(proj_out)
    bproj_zero = jnp.zeros((C, 1), jnp.float32)

    # 1) Verification run with NON-zero proj_out so the attention path is
    #    observable; checked against the fp32 pure-JAX reference. Tolerance is
    #    loosened slightly because matmul operands are bf16 (fp32 accumulation).
    kpw, kpb = jax.random.split(jax.random.PRNGKey(1))
    wproj_dbg = 0.05 * jax.random.normal(kpw, (C, C), jnp.float32)
    bproj_dbg = 0.01 * jax.random.normal(kpb, (C, 1), jnp.float32)
    params_dbg = (gamma, beta, wqkv, bqkv, wproj_dbg, bproj_dbg)
    out_dbg = jax.block_until_ready(
        attention_block(x, params_dbg, num_heads=num_heads))
    ref_dbg = jax.block_until_ready(
        attention_block_ref(x, params_dbg, num_heads=num_heads))
    assert out_dbg.shape == (B, C, H, W)
    assert jnp.allclose(out_dbg, ref_dbg, rtol=2e-2, atol=2e-2), "kernel mismatch"

    # 2) Faithful run with the module's actual init (zero proj_out): output
    #    equals the residual input, as in the freshly-initialized PyTorch module.
    params = (gamma, beta, wqkv, bqkv, wproj_zero, bproj_zero)
    out = jax.block_until_ready(attention_block(x, params, num_heads=num_heads))
    assert jnp.allclose(out, x, rtol=1e-5, atol=1e-5)

    print("KERNEL_OK")
</pallas_src>

<mosaic_0001>
module attributes {stable_mosaic.version = 11 : i64} {
  func.func @_norm_qkv_kernel(%arg0: i32, %arg1: memref<1x32x64xf32, #tpu.memory_space<vmem>>, %arg2: memref<32x1xf32, #tpu.memory_space<vmem>>, %arg3: memref<32x1xf32, #tpu.memory_space<vmem>>, %arg4: memref<32x32xbf16, #tpu.memory_space<vmem>>, %arg5: memref<32x32xbf16, #tpu.memory_space<vmem>>, %arg6: memref<32x32xbf16, #tpu.memory_space<vmem>>, %arg7: memref<32x1xf32, #tpu.memory_space<vmem>>, %arg8: memref<32x1xf32, #tpu.memory_space<vmem>>, %arg9: memref<32x1xf32, #tpu.memory_space<vmem>>, %arg10: memref<1x32x64xbf16, #tpu.memory_space<vmem>>, %arg11: memref<1x32x64xbf16, #tpu.memory_space<vmem>>, %arg12: memref<1x32x64xbf16, #tpu.memory_space<vmem>>) attributes {dimension_semantics = [#tpu.dimension_semantics<parallel>], iteration_bounds = array<i64: 2>, scalar_prefetch = 0 : i64, scratch_operands = 0 : i64, tpu.core_type = #tpu.core_type<tc>, window_params = [{transform_indices = @transform_0, window_bounds = array<i64: 1, 32, 64>}, {pipeline_mode = #tpu.pipeline_mode<synchronous>, transform_indices = @transform_1, window_bounds = array<i64: 32, 1>}, {pipeline_mode = #tpu.pipeline_mode<synchronous>, transform_indices = @transform_2, window_bounds = array<i64: 32, 1>}, {pipeline_mode = #tpu.pipeline_mode<synchronous>, transform_indices = @transform_3, window_bounds = array<i64: 32, 32>}, {pipeline_mode = #tpu.pipeline_mode<synchronous>, transform_indices = @transform_4, window_bounds = array<i64: 32, 32>}, {pipeline_mode = #tpu.pipeline_mode<synchronous>, transform_indices = @transform_5, window_bounds = array<i64: 32, 32>}, {pipeline_mode = #tpu.pipeline_mode<synchronous>, transform_indices = @transform_6, window_bounds = array<i64: 32, 1>}, {pipeline_mode = #tpu.pipeline_mode<synchronous>, transform_indices = @transform_7, window_bounds = array<i64: 32, 1>}, {pipeline_mode = #tpu.pipeline_mode<synchronous>, transform_indices = @transform_8, window_bounds = array<i64: 32, 1>}, {transform_indices = @transform_9, window_bounds = array<i64: 1, 32, 64>}, {transform_indices = @transform_10, window_bounds = array<i64: 1, 32, 64>}, {transform_indices = @transform_11, window_bounds = array<i64: 1, 32, 64>}]} {
    %c0 = arith.constant 0 : index
    %c0_0 = arith.constant 0 : index
    %c0_1 = arith.constant 0 : index
    %0 = vector.load %arg1[%c0, %c0_0, %c0_1] : memref<1x32x64xf32, #tpu.memory_space<vmem>>, vector<1x32x64xf32>
    %1 = vector.shape_cast %0 : vector<1x32x64xf32> to vector<32x64xf32>
    %cst = arith.constant dense<0.000000e+00> : vector<32xf32>
    %2 = vector.multi_reduction <add>, %1, %cst [1] : vector<32x64xf32> to vector<32xf32>
    %3 = vector.shape_cast %2 : vector<32xf32> to vector<32x1xf32>
    %4 = arith.mulf %1, %1 : vector<32x64xf32>
    %cst_2 = arith.constant dense<0.000000e+00> : vector<32xf32>
    %5 = vector.multi_reduction <add>, %4, %cst_2 [1] : vector<32x64xf32> to vector<32xf32>
    %6 = vector.shape_cast %5 : vector<32xf32> to vector<32x1xf32>
    %cst_3 = arith.constant dense<0.000000e+00> : vector<32xf32>
    %7 = vector.multi_reduction <add>, %3, %cst_3 [1] : vector<32x1xf32> to vector<32xf32>
    %8 = vector.shape_cast %7 : vector<32xf32> to vector<32x1xf32>
    %cst_4 = arith.constant dense<0.000000e+00> : vector<32xf32>
    %9 = vector.multi_reduction <add>, %6, %cst_4 [1] : vector<32x1xf32> to vector<32xf32>
    %10 = vector.shape_cast %9 : vector<32xf32> to vector<32x1xf32>
    %cst_5 = arith.constant 6.400000e+01 : f32
    %11 = vector.broadcast %cst_5 : f32 to vector<32x1xf32>
    %12 = arith.divf %8, %11 : vector<32x1xf32>
    %cst_6 = arith.constant 6.400000e+01 : f32
    %13 = vector.broadcast %cst_6 : f32 to vector<32x1xf32>
    %14 = arith.divf %10, %13 : vector<32x1xf32>
    %15 = arith.mulf %12, %12 : vector<32x1xf32>
    %16 = arith.subf %14, %15 : vector<32x1xf32>
    %cst_7 = arith.constant 9.99999974E-6 : f32
    %17 = vector.broadcast %cst_7 : f32 to vector<32x1xf32>
    %18 = arith.addf %16, %17 : vector<32x1xf32>
    %19 = math.rsqrt %18 : vector<32x1xf32>
    %c0_8 = arith.constant 0 : index
    %c0_9 = arith.constant 0 : index
    %20 = vector.load %arg2[%c0_8, %c0_9] : memref<32x1xf32, #tpu.memory_space<vmem>>, vector<32x1xf32>
    %21 = arith.mulf %20, %19 : vector<32x1xf32>
    %c0_10 = arith.constant 0 : index
    %c0_11 = arith.constant 0 : index
    %22 = vector.load %arg3[%c0_10, %c0_11] : memref<32x1xf32, #tpu.memory_space<vmem>>, vector<32x1xf32>
    %23 = arith.mulf %12, %21 : vector<32x1xf32>
    %24 = arith.subf %22, %23 : vector<32x1xf32>
    %25 = vector.broadcast %21 : vector<32x1xf32> to vector<32x64xf32>
    %26 = arith.mulf %1, %25 : vector<32x64xf32>
    %27 = vector.broadcast %24 : vector<32x1xf32> to vector<32x64xf32>
    %28 = arith.addf %26, %27 : vector<32x64xf32>
    %29 = arith.truncf %28 : vector<32x64xf32> to vector<32x64xbf16>
    %c0_12 = arith.constant 0 : index
    %c0_13 = arith.constant 0 : index
    %30 = vector.load %arg4[%c0_12, %c0_13] : memref<32x32xbf16, #tpu.memory_space<vmem>>, vector<32x32xbf16>
    %cst_14 = arith.constant dense<0.000000e+00> : vector<32x64xf32>
    %31 = tpu.matmul %30, %29, %cst_14 {dimension_numbers = #tpu.dot_dimension_numbers<[1], [0], [0], [1], [0, 0, 1, 1], [], []>} : vector<32x32xbf16>, vector<32x64xbf16>, vector<32x64xf32> -> vector<32x64xf32>
    %c0_15 = arith.constant 0 : index
    %c0_16 = arith.constant 0 : index
    %32 = vector.load %arg7[%c0_15, %c0_16] : memref<32x1xf32, #tpu.memory_space<vmem>>, vector<32x1xf32>
    %33 = vector.broadcast %32 : vector<32x1xf32> to vector<32x64xf32>
    %34 = arith.addf %31, %33 : vector<32x64xf32>
    %c0_17 = arith.constant 0 : index
    %c0_18 = arith.constant 0 : index
    %35 = vector.load %arg5[%c0_17, %c0_18] : memref<32x32xbf16, #tpu.memory_space<vmem>>, vector<32x32xbf16>
    %cst_19 = arith.constant dense<0.000000e+00> : vector<32x64xf32>
    %36 = tpu.matmul %35, %29, %cst_19 {dimension_numbers = #tpu.dot_dimension_numbers<[1], [0], [0], [1], [0, 0, 1, 1], [], []>} : vector<32x32xbf16>, vector<32x64xbf16>, vector<32x64xf32> -> vector<32x64xf32>
    %c0_20 = arith.constant 0 : index
    %c0_21 = arith.constant 0 : index
    %37 = vector.load %arg8[%c0_20, %c0_21] : memref<32x1xf32, #tpu.memory_space<vmem>>, vector<32x1xf32>
    %38 = vector.broadcast %37 : vector<32x1xf32> to vector<32x64xf32>
    %39 = arith.addf %36, %38 : vector<32x64xf32>
    %c0_22 = arith.constant 0 : index
    %c0_23 = arith.constant 0 : index
    %40 = vector.load %arg6[%c0_22, %c0_23] : memref<32x32xbf16, #tpu.memory_space<vmem>>, vector<32x32xbf16>
    %cst_24 = arith.constant dense<0.000000e+00> : vector<32x64xf32>
    %41 = tpu.matmul %40, %29, %cst_24 {dimension_numbers = #tpu.dot_dimension_numbers<[1], [0], [0], [1], [0, 0, 1, 1], [], []>} : vector<32x32xbf16>, vector<32x64xbf16>, vector<32x64xf32> -> vector<32x64xf32>
    %c0_25 = arith.constant 0 : index
    %c0_26 = arith.constant 0 : index
    %42 = vector.load %arg9[%c0_25, %c0_26] : memref<32x1xf32, #tpu.memory_space<vmem>>, vector<32x1xf32>
    %43 = vector.broadcast %42 : vector<32x1xf32> to vector<32x64xf32>
    %44 = arith.addf %41, %43 : vector<32x64xf32>
    %cst_27 = arith.constant 0.353553385 : f32
    %45 = vector.broadcast %cst_27 : f32 to vector<32x64xf32>
    %46 = arith.mulf %34, %45 : vector<32x64xf32>
    %47 = arith.truncf %46 : vector<32x64xf32> to vector<32x64xbf16>
    %c0_28 = arith.constant 0 : index
    %c0_29 = arith.constant 0 : index
    %c0_30 = arith.constant 0 : index
    %48 = vector.load %arg10[%c0_28, %c0_29, %c0_30] : memref<1x32x64xbf16, #tpu.memory_space<vmem>>, vector<1x32x64xbf16>
    %49 = vector.shape_cast %48 : vector<1x32x64xbf16> to vector<32x64xbf16>
    %50 = vector.shape_cast %47 : vector<32x64xbf16> to vector<1x32x64xbf16>
    tpu.vector_store %arg10[%c0_28, %c0_29, %c0_30], %50 {strides = array<i32>} : memref<1x32x64xbf16, #tpu.memory_space<vmem>>, vector<1x32x64xbf16>,
    %51 = arith.truncf %39 : vector<32x64xf32> to vector<32x64xbf16>
    %c0_31 = arith.constant 0 : index
    %c0_32 = arith.constant 0 : index
    %c0_33 = arith.constant 0 : index
    %52 = vector.load %arg11[%c0_31, %c0_32, %c0_33] : memref<1x32x64xbf16, #tpu.memory_space<vmem>>, vector<1x32x64xbf16>
    %53 = vector.shape_cast %52 : vector<1x32x64xbf16> to vector<32x64xbf16>
    %54 = vector.shape_cast %51 : vector<32x64xbf16> to vector<1x32x64xbf16>
    tpu.vector_store %arg11[%c0_31, %c0_32, %c0_33], %54 {strides = array<i32>} : memref<1x32x64xbf16, #tpu.memory_space<vmem>>, vector<1x32x64xbf16>,
    %55 = arith.truncf %44 : vector<32x64xf32> to vector<32x64xbf16>
    %c0_34 = arith.constant 0 : index
    %c0_35 = arith.constant 0 : index
    %c0_36 = arith.constant 0 : index
    %56 = vector.load %arg12[%c0_34, %c0_35, %c0_36] : memref<1x32x64xbf16, #tpu.memory_space<vmem>>, vector<1x32x64xbf16>
    %57 = vector.shape_cast %56 : vector<1x32x64xbf16> to vector<32x64xbf16>
    %58 = vector.shape_cast %55 : vector<32x64xbf16> to vector<1x32x64xbf16>
    tpu.vector_store %arg12[%c0_34, %c0_35, %c0_36], %58 {strides = array<i32>} : memref<1x32x64xbf16, #tpu.memory_space<vmem>>, vector<1x32x64xbf16>,
    return
  }
  func.func @transform_0(%arg0: i32) -> (i32, i32, i32) {
    %c0_i32 = arith.constant 0 : i32
    %c0_i32_0 = arith.constant 0 : i32
    %c0_i32_1 = arith.constant 0 : i32
    return %arg0, %c0_i32, %c0_i32_0 : i32, i32, i32
  }
  func.func @transform_1(%arg0: i32) -> (i32, i32) {
    %c0_i32 = arith.constant 0 : i32
    %c0_i32_0 = arith.constant 0 : i32
    %c0_i32_1 = arith.constant 0 : i32
    return %c0_i32, %c0_i32_0 : i32, i32
  }
  func.func @transform_2(%arg0: i32) -> (i32, i32) {
    %c0_i32 = arith.constant 0 : i32
    %c0_i32_0 = arith.constant 0 : i32
    %c0_i32_1 = arith.constant 0 : i32
    return %c0_i32, %c0_i32_0 : i32, i32
  }
  func.func @transform_3(%arg0: i32) -> (i32, i32) {
    %c0_i32 = arith.constant 0 : i32
    %c0_i32_0 = arith.constant 0 : i32
    %c0_i32_1 = arith.constant 0 : i32
    return %c0_i32, %c0_i32_0 : i32, i32
  }
  func.func @transform_4(%arg0: i32) -> (i32, i32) {
    %c0_i32 = arith.constant 0 : i32
    %c0_i32_0 = arith.constant 0 : i32
    %c0_i32_1 = arith.constant 0 : i32
    return %c0_i32, %c0_i32_0 : i32, i32
  }
  func.func @transform_5(%arg0: i32) -> (i32, i32) {
    %c0_i32 = arith.constant 0 : i32
    %c0_i32_0 = arith.constant 0 : i32
    %c0_i32_1 = arith.constant 0 : i32
    return %c0_i32, %c0_i32_0 : i32, i32
  }
  func.func @transform_6(%arg0: i32) -> (i32, i32) {
    %c0_i32 = arith.constant 0 : i32
    %c0_i32_0 = arith.constant 0 : i32
    %c0_i32_1 = arith.constant 0 : i32
    return %c0_i32, %c0_i32_0 : i32, i32
  }
  func.func @transform_7(%arg0: i32) -> (i32, i32) {
    %c0_i32 = arith.constant 0 : i32
    %c0_i32_0 = arith.constant 0 : i32
    %c0_i32_1 = arith.constant 0 : i32
    return %c0_i32, %c0_i32_0 : i32, i32
  }
  func.func @transform_8(%arg0: i32) -> (i32, i32) {
    %c0_i32 = arith.constant 0 : i32
    %c0_i32_0 = arith.constant 0 : i32
    %c0_i32_1 = arith.constant 0 : i32
    return %c0_i32, %c0_i32_0 : i32, i32
  }
  func.func @transform_9(%arg0: i32) -> (i32, i32, i32) {
    %c0_i32 = arith.constant 0 : i32
    %c0_i32_0 = arith.constant 0 : i32
    %c0_i32_1 = arith.constant 0 : i32
    return %arg0, %c0_i32, %c0_i32_0 : i32, i32, i32
  }
  func.func @transform_10(%arg0: i32) -> (i32, i32, i32) {
    %c0_i32 = arith.constant 0 : i32
    %c0_i32_0 = arith.constant 0 : i32
    %c0_i32_1 = arith.constant 0 : i32
    return %arg0, %c0_i32, %c0_i32_0 : i32, i32, i32
  }
  func.func @transform_11(%arg0: i32) -> (i32, i32, i32) {
    %c0_i32 = arith.constant 0 : i32
    %c0_i32_0 = arith.constant 0 : i32
    %c0_i32_1 = arith.constant 0 : i32
    return %arg0, %c0_i32, %c0_i32_0 : i32, i32, i32
  }
}

</mosaic_0001>

<bundles_post_ra>
// kernel: tpu_custom_call.1
= control target key start
LH: loop header
LB: loop body
LE: loop exit
PB: predicated region body
PF: predicated region fallthrough
CT: control target
= control target key end

     0   :  { %s1772_s0 = inlined_call_operand.vmem [shape: f32[2,32,64], index: 0, kind: input, shape index: {}]   ;;  %s1773_s1 = inlined_call_operand.vmem [shape: f32[32,1], index: 1, kind: input, shape index: {}]   ;;  %s1774_s2 = inlined_call_operand.vmem [shape: f32[32,1], index: 2, kind: input, shape index: {}]   ;;  %s1775_s3 = inlined_call_operand.vmem [shape: bf16[32,32], index: 3, kind: input, shape index: {}]   ;;  %s1776_s4 = inlined_call_operand.vmem [shape: bf16[32,32], index: 4, kind: input, shape index: {}]   ;;  %s1777_s5 = inlined_call_operand.vmem [shape: bf16[32,32], index: 5, kind: input, shape index: {}]   ;;  %s1778_s6 = inlined_call_operand.vmem [shape: f32[32,1], index: 6, kind: input, shape index: {}]   ;;  %s1779_s7 = inlined_call_operand.vmem [shape: f32[32,1], index: 7, kind: input, shape index: {}]   ;;  %s1780_s8 = inlined_call_operand.vmem [shape: f32[32,1], index: 8, kind: input, shape index: {}]   ;;  %s1781_s9 = inlined_call_operand.hbm [shape: bf16[2,32,64], index: 9, kind: output, shape index: {0}]   ;;  %s1782_s10 = inlined_call_operand.hbm [shape: bf16[2,32,64], index: 10, kind: output, shape index: {1}]   ;;  %s1783_s11 = inlined_call_operand.hbm [shape: bf16[2,32,64], index: 11, kind: output, shape index: {2}]  }
   0x1   :  { %1786 = sst [smem:[#allocation9_spill]] %s1772_s0 }
   0x2   :  { %1787 = sst [smem:[#allocation10_spill]] %s1773_s1 }
   0x3   :  { %1788 = sst [smem:[#allocation11_spill]] %s1774_s2 }
   0x4   :  { %1789 = sst [smem:[#allocation12_spill]] %s1775_s3 }
   0x5   :  { %1790 = sst [smem:[#allocation13_spill]] %s1776_s4 }
   0x6   :  { %17 = vsyncpa [#allocation3], 0 }
   0x7   :  { %19 = vsyncpa [#allocation3 + $0x1], 0 }
   0x8   :  { %20 = vsyncpa [#allocation5], 0 }
   0x9   :  { %22 = vsyncpa [#allocation5 + $0x1], 0  ;;  %s1418_s17 = smov 0   ;;  %s1420_s18 = smov 0  }
   0xa   :  { %s1422_s19 = smov 0   ;;  %s1424_s20 = smov 0  }
   0xb LB: > { %s1439_s21 = sadd.s32 4294967295, %s1350_s20   ;;  %s1784_s22 = sadd.s32 4294967294, %s1350_s20   ;;  %s1350_s20 = sphi %s1424_s20, %s1805_s20   ;;  %s1346_s19 = sphi %s1422_s19, %s1804_s19   ;;  %s1342_s18 = sphi %s1420_s18, %s1803_s18   ;;  %s1338_s17 = sphi %s1418_s17, %s1802_s17  }
   0xc   : > { %s1443_s23 = sadd.s32 1, %s1350_s20   ;;  %s229_s24 = sadd.s32 1, %s1346_s19 }
   0xd   : > { %s226_s25 = ssub.s32 %s1350_s20, %s1443_s23  ;;  %p239_p0 = scmp.ne.s32.totalorder %s1346_s19, %s1342_s18 }
   0xe   : > { %p227_p1 = scmp.eq.s32.totalorder %s226_s25, 0  ;;  %p240_p2 = scmp.eq.s32.totalorder %s1439_s21, 1 }
   0xf   : > { %p245_p3 = scmp.ne.s32.totalorder %s1342_s18, %s1338_s17  ;;  %p246_p4 = scmp.eq.s32.totalorder %s1784_s22, 1 }
  0x10   : > { %s1456_s26 = scalar_select %p227_p1, %s1346_s19, %s229_s24  }
  0x11   : > { %p1458_p5 = por %p240_p2, %p239_p0  ;;  %p1462_p6 = por %p246_p4, %p245_p3 }
  0x12   : > { %p1067_p7 = scmp.ge.s32.totalorder %s1350_s20, 1  ;;  %p348_p8 = scmp.lt.s32.totalorder %s1350_s20, 3 }
  0x14   : > { %p349_p9 = pnand %p1067_p7, %p348_p8 }
  0x15   : > { %p398_p10 = scmp.lt.s32.totalorder (!%p349_p9), %s1439_s21, 1  ;;  %vm408_vm0 = vcmask (!%p349_p9), 523264   ;;  %s1793_s0 = sld [smem:[#allocation9_spill]] (!%p349_p9)  ;;  %v1352_v16 = vmov (!%p349_p9), 0   ;;  %v545_v50 = vld [vmem:[%s1778_s6 + $0x8] sm:$0xff] (!%p349_p9)  ;;  %v547_v53 = vld [vmem:[%s1778_s6 + $0x18] sm:$0xff] (!%p349_p9) }
  0x16   : > { %352 = sbr.rel (%p349_p9) target bundleno = 653 (0x28d), region = 56  ;;  %1212 = vset.pattern.permute.xlu0 (!%p349_p9), %v1352_v16  ;;  %1213 = vset.pattern.permute.xlu1 (!%p349_p9), %v1352_v16  ;;  %s1794_s1 = sld [smem:[#allocation10_spill]] (!%p349_p9)  ;;  %v639_v58 = vld [vmem:[%s1779_s7 + $0x8] sm:$0xff] (!%p349_p9)  ;;  %v641_v62 = vld [vmem:[%s1779_s7 + $0x18] sm:$0xff] (!%p349_p9)  ;;  %v546_v16 = vld [vmem:[%s1778_s6 + $0x10] sm:$0xff] (!%p349_p9)  ;;  %vm578_vm1 = vcmask (!%p349_p9), 261120  }
  0x17   : > { %s1795_s2 = sld [smem:[#allocation11_spill]] (!%p349_p9)  ;;  %s1796_s3 = sld [smem:[#allocation12_spill]] (!%p349_p9)  ;;  %vm840_vm2 = vcmask (!%p349_p9), 519168  }
  0x18   : > { %s1797_s4 = sld [smem:[#allocation13_spill]] (!%p349_p9)  ;;  %s1785_s22 = sand.u32 (!%p349_p9), 1, %s1342_s18  }
  0x19   : > { %s1602_s15 = sshll.u32 (!%p349_p9), %s1439_s21, 8 }
  0x1c   : > { %v470_v45 = vld [vmem:[%s1794_s1] sm:$0xff] (!%p349_p9)  ;;  %v471_v48 = vld [vmem:[%s1794_s1 + $0x8] sm:$0xff] (!%p349_p9)  ;;  %v472_v52 = vld [vmem:[%s1794_s1 + $0x10] sm:$0xff] (!%p349_p9) }
  0x1d   : > { %s399_s29 = scalar_select %p398_p10, %s1439_s21, 1  ;;  %v473_v57 = vld [vmem:[%s1794_s1 + $0x18] sm:$0xff]  ;;  %v478_v61 = vld [vmem:[%s1795_s2] sm:$0xff] }
  0x1f   : > { %s1108_s30 = sshll.u32 %s399_s29, 5 }
  0x20   : > { %s402_s14 = scalar_lea.vmem %s1793_s0, %s1108_s30  ;;  %s1592_s30 = sshll.u32 %s1785_s22, 4 }
  0x21   : > { %v1473_v0 = vld [vmem:[%s402_s14 + $0x18] sm:$0xff]  ;;  %v1475_v1 = vld [vmem:[%s402_s14] sm:$0xff]  ;;  %v1477_v2 = vld [vmem:[%s402_s14 + $0x8] sm:$0xff]  ;;  %s1597_s12 = scalar_lea.vmem [#allocation4], %s1592_s30  ;;  %s1607_s16 = scalar_lea.vmem [#allocation2], %s1592_s30 }
  0x22   : > { %v418_v3 = vsel %vm408_vm0, %v1473_v0, 0.0  ;;  %v409_v4 = vsel %vm408_vm0, %v1475_v1, 0.0  ;;  %v421_v5 = vmul.f32 %v1475_v1, %v1475_v1  ;;  %v412_v7 = vsel %vm408_vm0, %v1477_v2, 0.0  ;;  %v1490_v9 = vld [vmem:[%s402_s14 + $0x10] sm:$0xff]  ;;  %s925_s13 = sshll.u32 %s1597_s12, 4  ;;  %s909_s24 = sshll.u32 %s1607_s16, 4  ;;  %s1610_s13 = int_to_ptr.vmem [resolvable:$true] %s925_s13  ;;  %s1624_s24 = int_to_ptr.vmem [resolvable:$true] %s909_s24 }
  0x23   : > { %419 = vadd.xlane.f32.xlu1 %v418_v3  ;;  %410 = vadd.xlane.f32.xlu0 %v409_v4  ;;  %v422_v8 = vmul.f32 %v1477_v2, %v1477_v2  ;;  %v415_v11 = vsel %vm408_vm0, %v1490_v9, 0.0  ;;  %v424_v12 = vmul.f32 %v1473_v0, %v1473_v0  ;;  %v423_v13 = vmul.f32 %v1490_v9, %v1490_v9  ;;  %v479_v4 = vld [vmem:[%s1795_s2 + $0x8] sm:$0xff]  ;;  %s1620_s22 = scalar_lea.hbm %s1782_s10, %s1602_s15  ;;  %s1636_s14 = scalar_lea.hbm %s1781_s9, %s1602_s15 }
  0x24   : > { %v425_v6 = vsel %vm408_vm0, %v421_v5, 0.0  ;;  %v732_v5 = vld [vmem:[%s1780_s8 + $0x8] sm:$0xff]  ;;  %s1798_s0 = sand.u32 1, %s1439_s21  }
  0x25   : > { %v428_v10 = vsel %vm408_vm0, %v422_v8, 0.0  ;;  %v434_v14 = vsel %vm408_vm0, %v424_v12, 0.0  ;;  %v431_v15 = vsel %vm408_vm0, %v423_v13, 0.0  ;;  %v480_v8 = vld [vmem:[%s1795_s2 + $0x10] sm:$0xff]  ;;  %v481_v13 = vld [vmem:[%s1795_s2 + $0x18] sm:$0xff]  ;;  %s1644_s1 = scalar_lea.sflag [#allocation5], %s1798_s0 }
  0x26   : > { %s1228_s2 = scalar_lea.vmem %s1610_s13, 256 }
  0x27   : > { %426 = vadd.xlane.f32.xlu1 %v425_v6  ;;  %413 = vadd.xlane.f32.xlu0 %v412_v7  ;;  %p1229_p11 = scmp.ne.s32.totalorder %s1610_s13, %s1228_s2 }
  0x29   : > { %p1230_p12 = pnand %p1229_p11, %p1458_p5 }
  0x2b   : > { %429 = vadd.xlane.f32.xlu1 %v428_v10  ;;  %416 = vadd.xlane.f32.xlu0 %v415_v11  ;;  %v734_v10 = vld [vmem:[%s1780_s8 + $0x18] sm:$0xff]  ;;  %p1231_p13 = pneg %p1230_p12 }
  0x2f   : > { %435 = vadd.xlane.f32.xlu1 %v434_v14  ;;  %432 = vadd.xlane.f32.xlu0 %v431_v15  ;;  %v544_v15 = vld [vmem:[%s1778_s6] sm:$0xff] }
  0xb0   : > { %v420_v17 = vpop.xlane.xlu1 %419  ;;  %v411_v18 = vpop.xlane.xlu0 %410 }
  0xb1   : > { %v446_v19 = vmul.f32 0.015625, %v411_v18  ;;  %v449_v26 = vmul.f32 0.015625, %v420_v17  ;;  %v1214_v17 = vld [vmem:[%s1796_s3] sm:$0xff]  }
  0xb2   : > { %v1215_v18 = vld [vmem:[%s1797_s4] sm:$0xff]   ;;  %1140 = vmatprep.mubr.msk.bf16.mxu0 %vm578_vm1, %v1214_v17 }
  0xb3   : > { %v454_v22 = vmul.f32 %v446_v19, %v446_v19  ;;  %v457_v34 = vmul.f32 %v449_v26, %v449_v26  ;;  %1148 = vmatprep.mubr.msk.bf16.mxu1 %vm578_vm1, %v1215_v18 }
  0xb4   : > { %v427_v20 = vpop.xlane.xlu1 %426  ;;  %v414_v21 = vpop.xlane.xlu0 %413 }
  0xb5   : > { %v450_v23 = vmul.f32 0.015625, %v427_v20  ;;  %v447_v24 = vmul.f32 0.015625, %v414_v21  ;;  %v640_v20 = vld [vmem:[%s1779_s7 + $0x10] sm:$0xff]  ;;  %v731_v21 = vld [vmem:[%s1780_s8] sm:$0xff] }
  0xb7   : > { %v458_v25 = vsub.f32 %v450_v23, %v454_v22  ;;  %v455_v30 = vmul.f32 %v447_v24, %v447_v24  ;;  %v733_v22 = vld [vmem:[%s1780_s8 + $0x10] sm:$0xff] }
  0xb8   : > { %v430_v27 = vpop.xlane.xlu1 %429  ;;  %v417_v28 = vpop.xlane.xlu0 %416 }
  0xb9   : > { %v462_v29 = vadd.f32 1e-05, %v458_v25  ;;  %v451_v31 = vmul.f32 0.015625, %v430_v27  ;;  %v448_v32 = vmul.f32 0.015625, %v417_v28 }
  0xbb   : > { %1220 = vrsqrt.f32 %v462_v29  ;;  %v459_v33 = vsub.f32 %v451_v31, %v455_v30  ;;  %v456_v38 = vmul.f32 %v448_v32, %v448_v32 }
  0xbc   : > { %v436_v35 = vpop.xlane.xlu1 %435  ;;  %v433_v36 = vpop.xlane.xlu0 %432 }
  0xbd   : > { %v463_v37 = vadd.f32 1e-05, %v459_v33  ;;  %v453_v39 = vmul.f32 0.015625, %v436_v35  ;;  %v452_v40 = vmul.f32 0.015625, %v433_v36 }
  0xbf   : > { %1222 = vrsqrt.f32 %v463_v37  ;;  %v461_v41 = vsub.f32 %v453_v39, %v457_v34  ;;  %v460_v42 = vsub.f32 %v452_v40, %v456_v38 }
  0xc1   : > { %v464_v43 = vadd.f32 1e-05, %v460_v42  ;;  %v465_v44 = vadd.f32 1e-05, %v461_v41 }
  0xc3   : > { %1224 = vrsqrt.f32 %v464_v43 }
  0xc4   : > { %1226 = vrsqrt.f32 %v465_v44 }
  0xc5   : > { %v1221_v46 = vpop.eup %1220 }
  0xc6   : > { %v474_v47 = vmul.f32 %v1221_v46, %v470_v45 }
  0xc8   : > { %492 = vperm.xlu0 %1212, %v474_v47   ;;  %v482_v60 = vmul.f32 %v474_v47, %v446_v19  ;;  %v638_v19 = vld [vmem:[%s1779_s7] sm:$0xff] }
  0xc9   : > { %v1223_v49 = vpop.eup %1222 }
  0xca   : > { %v475_v51 = vmul.f32 %v1223_v49, %v471_v48  ;;  %v486_v63 = vsub.f32 %v478_v61, %v482_v60 }
  0xcc   : > { %555 = vperm.xlu0 %1212, %v545_v50   ;;  %497 = vperm.xlu1 %1213, %v475_v51   ;;  %v483_v3 = vmul.f32 %v475_v51, %v447_v24 }
  0xcd   : > { %v1225_v54 = vpop.eup %1224 }
  0xce   : > { %v476_v55 = vmul.f32 %v1225_v54, %v472_v52  ;;  %v1227_v56 = vpop.eup %1226  ;;  %v487_v6 = vsub.f32 %v479_v4, %v483_v3 }
  0xcf   : > { %v477_v59 = vmul.f32 %v1227_v56, %v473_v57 }
  0xd0   : > { %565 = vperm.xlu0 %1212, %v547_v53   ;;  %502 = vperm.xlu1 %1213, %v476_v55   ;;  %v484_v7 = vmul.f32 %v476_v55, %v448_v32 }
  0xd1   : > { %v485_v12 = vmul.f32 %v477_v59, %v449_v26 }
  0xd2   : > { %v488_v11 = vsub.f32 %v480_v8, %v484_v7 }
  0xd3   : > { %v489_v14 = vsub.f32 %v481_v13, %v485_v12 }
  0xd4   : > { %649 = vperm.xlu0 %1212, %v639_v58   ;;  %507 = vperm.xlu1 %1213, %v477_v59  }
  0xd8   : > { %659 = vperm.xlu0 %1212, %v641_v62   ;;  %516 = vperm.xlu1 %1213, %v486_v63  }
  0xdc   : > { %742 = vperm.xlu0 %1212, %v732_v5   ;;  %521 = vperm.xlu1 %1213, %v487_v6  }
  0xe0   : > { %752 = vperm.xlu0 %1212, %v734_v10   ;;  %526 = vperm.xlu1 %1213, %v488_v11  }
  0xe4   : > { %531 = vperm.xlu1 %1213, %v489_v14  }
  0xe8   : > { %550 = vperm.xlu1 %1213, %v544_v15  }
  0xec   : > { %560 = vperm.xlu1 %1213, %v546_v16  }
  0xf0   : > { %644 = vperm.xlu1 %1213, %v638_v19  }
  0xf4   : > { %654 = vperm.xlu1 %1213, %v640_v20  }
  0xf8   : > { %737 = vperm.xlu1 %1213, %v731_v21  }
  0xfc   : > { %747 = vperm.xlu1 %1213, %v733_v22  }
 0x147   : > { %v493_v26 = vpop.permute.xlu0 %492 }
 0x148   : > { %v510_v28 = vmul.f32 %v493_v26, %v1475_v1  ;;  %v1216_v1 = vld [vmem:[%s1796_s3 + $0x8] sm:$0xff]  }
 0x14b   : > { %v498_v23 = vpop.permute.xlu1 %497  ;;  %v556_v42 = vpop.permute.xlu0 %555 }
 0x14c   : > { %v511_v29 = vmul.f32 %v498_v23, %v1477_v2  ;;  %v1217_v2 = vld [vmem:[%s1797_s4 + $0x8] sm:$0xff]  }
 0x14f   : > { %v503_v24 = vpop.permute.xlu1 %502  ;;  %v566_v44 = vpop.permute.xlu0 %565 }
 0x150   : > { %v512_v35 = vmul.f32 %v503_v24, %v1490_v9  ;;  %v1219_v9 = vld [vmem:[%s1777_s5 + $0x8] sm:$0xff]  }
 0x153   : > { %v508_v25 = vpop.permute.xlu1 %507  ;;  %v650_v46 = vpop.permute.xlu0 %649 }
 0x154   : > { %v513_v36 = vmul.f32 %v508_v25, %v1473_v0  ;;  %v1218_v0 = vld [vmem:[%s1777_s5] sm:$0xff]  }
 0x157   : > { %v517_v27 = vpop.permute.xlu1 %516  ;;  %v660_v48 = vpop.permute.xlu0 %659 }
 0x158   : > { %v534_v31 = vadd.f32 %v517_v27, %v510_v28 }
 0x15b   : > { %v522_v30 = vpop.permute.xlu1 %521  ;;  %v1604_v5 = vpop.permute.xlu0 %742 }
 0x15c   : > { %v535_v32 = vadd.f32 %v522_v30, %v511_v29 }
 0x15e   : > { %v538_v33 = vpack.c.bf16 %v535_v32, %v534_v31 }
 0x15f   : > { %v527_v34 = vpop.permute.xlu1 %526 }
 0x160   : > { %1136 = vmatprep.subr.bf16.mxu0 %v538_v33  ;;  %1144 = vmatprep.subr.bf16.mxu1 %v538_v33  ;;  %v536_v38 = vadd.f32 %v527_v34, %v512_v35 }
 0x161   : > { %1137 = vmatpush3.bf16.msra.mxu0 %v538_v33  ;;  %1145 = vmatpush3.bf16.msra.mxu1 %v538_v33 }
 0x163   : > { %v532_v37 = vpop.permute.xlu1 %531 }
 0x164   : > { %v537_v39 = vadd.f32 %v532_v37, %v513_v36 }
 0x166   : > { %v539_v40 = vpack.c.bf16 %v537_v39, %v536_v38 }
 0x167   : > { %v551_v41 = vpop.permute.xlu1 %550 }
 0x168   : > { %1138 = vmatprep.subr.bf16.mxu0 %v539_v40  ;;  %1146 = vmatprep.subr.bf16.mxu1 %v539_v40 }
 0x169   : > { %1139 = vmatpush3.bf16.msra.mxu0 %v539_v40  ;;  %1147 = vmatpush3.bf16.msra.mxu1 %v539_v40 }
 0x16a   : > { %1152 = vmatprep.subr.bf16.mxu0 %v538_v33 }
 0x16b   : > { %v561_v43 = vpop.permute.xlu1 %560 }
 0x16c   : > { %1141 = vmatmul.mubr.msk.bf16.vlgmr.msra.gmra.mrb[0].mxu0 %vm578_vm1, %v1216_v1  ;;  %1149 = vmatmul.mubr.msk.bf16.vlgmr.msra.gmra.mrb[0].mxu1 %vm578_vm1, %v1217_v2 }
 0x16d   : > { %1153 = vmatpush3.bf16.msra.mxu0 %v538_v33  ;;  %1156 = vmatprep.mubr.msk.bf16.mxu0 %vm578_vm1, %v1218_v0 }
 0x16e   : > { %1154 = vmatprep.subr.bf16.mxu0 %v539_v40 }
 0x16f   : > { %v645_v45 = vpop.permute.xlu1 %644 }
 0x171   : > { %1155 = vmatpush3.bf16.msra.mxu0 %v539_v40 }
 0x173   : > { %v655_v47 = vpop.permute.xlu1 %654 }
 0x174   : > { %1157 = vmatmul.mubr.msk.bf16.vlgmr.msra.gmra.mrb[4].mxu0 %vm578_vm1, %v1219_v9 }
 0x177   : > { %v1594_v49 = vpop.permute.xlu1 %737 }
 0x17b   : > { %v748_v18 = vpop.permute.xlu1 %747 }
 0x23f   : > { %v1142_v50 = vpop.f32.mrb[0].mxu0  ;;  %v1150_v51 = vpop.f32.mrb[0].mxu1 }
 0x240   : > { %v628_v52 = vadd.f32 %v1142_v50, %v561_v43  ;;  %v721_v53 = vadd.f32 %v1150_v51, %v655_v47  ;;  %v619_v54 = vpop.f32.mrb[1].mxu0  ;;  %v712_v55 = vpop.f32.mrb[1].mxu1 }
 0x241   : > { %v620_v56 = vadd.f32 %v619_v54, %v551_v41  ;;  %v713_v57 = vadd.f32 %v712_v55, %v645_v45  ;;  %v1143_v58 = vpop.f32.mrb[2].mxu0  ;;  %v1151_v59 = vpop.f32.mrb[2].mxu1 }
 0x242   : > { %v822_v60 = vmul.f32 0.35355338, %v628_v52  ;;  %v1115_v61 = vpack.c.bf16 %v721_v53, %v721_v53  ;;  %v631_v62 = vadd.f32 %v1143_v58, %v566_v44  ;;  %v724_v63 = vadd.f32 %v1151_v59, %v660_v48  ;;  %v622_v3 = vpop.f32.mrb[3].mxu0  ;;  %v715_v4 = vpop.f32.mrb[3].mxu1 }
 0x243   : > { %v820_v6 = vmul.f32 0.35355338, %v620_v56  ;;  %v1113_v7 = vpack.c.bf16 %v713_v57, %v713_v57  ;;  %v623_v8 = vadd.f32 %v622_v3, %v556_v42  ;;  %v716_v10 = vadd.f32 %v715_v4, %v650_v46 }
 0x244   : > { %v1111_v11 = vpack.c.bf16 %v822_v60, %v822_v60  ;;  %863 = vst.msk [vmem:[%s1597_s12 + $0x8] sm:$0xf] %vm840_vm2, %v1115_v61  ;;  %v823_v12 = vmul.f32 0.35355338, %v631_v62  ;;  %v1116_v13 = vpack.c.bf16 %v724_v63, %v724_v63 }
 0x245   : > { %v1109_v14 = vpack.c.bf16 %v820_v6, %v820_v6  ;;  %861 = vst.msk [vmem:[%s1597_s12] sm:$0xf] %vm840_vm2, %v1113_v7  ;;  %v821_v15 = vmul.f32 0.35355338, %v623_v8  ;;  %v1114_v16 = vpack.c.bf16 %v716_v10, %v716_v10 }
 0x246   : > { %843 = vst.msk [vmem:[%s1607_s16 + $0x8] sm:$0xf] %vm840_vm2, %v1111_v11  ;;  %v1112_v17 = vpack.c.bf16 %v823_v12, %v823_v12  ;;  %864 = vst.msk [vmem:[%s1597_s12 + $0xc] sm:$0xf] %vm840_vm2, %v1116_v13 }
 0x247   : > { %841 = vst.msk [vmem:[%s1607_s16] sm:$0xf] %vm840_vm2, %v1109_v14  ;;  %v1110_v19 = vpack.c.bf16 %v821_v15, %v821_v15  ;;  %862 = vst.msk [vmem:[%s1597_s12 + $0x4] sm:$0xf] %vm840_vm2, %v1114_v16  ;;  %v1158_v20 = vpop.f32.mrb[4].mxu0  ;;  %s1353_s12 = smov [#allocation4]  }
 0x248   : > { %844 = vst.msk [vmem:[%s1607_s16 + $0xc] sm:$0xf] %vm840_vm2, %v1112_v17  ;;  %v1640_v21 = vadd.f32 %v1158_v20, %v748_v18  ;;  %v805_v22 = vpop.f32.mrb[5].mxu0  ;;  %s1232_s3 = sshll.u32 %s1353_s12, 4  ;;  %s1233_s3 = int_to_ptr.vmem [resolvable:$false] %s1232_s3 }
 0x249   : > { %s1234_s4 = scalar_lea.vmem %s1233_s3, 512  ;;  %p1235_p0 = scmp.lt.s32.totalorder %s1610_s13, %s1233_s3 }
 0x24a   : > { %p1236_p1 = scmp.lt.s32.totalorder %s1234_s4, %s1228_s2 }
 0x24c   : > { %p1237_p2 = por %p1236_p1, %p1235_p0 }
 0x24e   : > { %p1238_p3 = pnand %p1237_p2, %p1231_p13 }
 0x250   : > { %1241 = shalt.err (!%p1238_p3)
}
 0x251   : > { %s1242_s0 = scalar_lea.hbm %s1620_s22, 256  ;;  %s1246_s29 = scalar_lea.hbm %s1782_s10, 512 }
 0x252   : > { %p1243_p4 = scmp.ne.s32.totalorder %s1620_s22, %s1242_s0  ;;  %p1247_p9 = scmp.lt.u32.totalorder %s1620_s22, %s1782_s10 }
 0x253   : > { %p1248_p10 = scmp.lt.u32.totalorder %s1246_s29, %s1242_s0  ;;  %p1250_p12 = scmp.lt.u32.totalorder %s1242_s0, %s1620_s22 }
 0x254   : > { %p1244_p7 = pnand %p1243_p4, %p1458_p5 }
 0x255   : > { %p1249_p11 = por %p1248_p10, %p1247_p9 }
 0x256   : > { %p1245_p8 = pneg %p1244_p7 }
 0x257   : > { %p1251_p13 = por %p1250_p12, %p1249_p11 }
 0x259   : > { %p1252_p0 = pnand %p1251_p13, %p1245_p8 }
 0x25b   : > { %1255 = shalt.err (!%p1252_p0)
}
 0x25c   : > { %s1354_s2 = smov 64   ;;  %s1355_s4 = smov 4   ;;  %v753_v23 = vpop.permute.xlu0 %752  ;;  %842 = vst.msk [vmem:[%s1607_s16 + $0x4] sm:$0xf] %vm840_vm2, %v1110_v19  ;;  %v806_v24 = vadd.f32 %v805_v22, %v1594_v49  ;;  %v1159_v25 = vpop.f32.mrb[6].mxu0  ;;  %v1119_v26 = vpack.c.bf16 %v1640_v21, %v1640_v21 }
 0x25d   : > { %1161 = dma.vmem_to_hbm [thread:$0]  (%p1458_p5), %s1610_s13, 256, %s1620_s22, %s1644_s1, %s1354_s2, %s1354_s2, %s1355_s4   ;;  %v817_v27 = vadd.f32 %v1159_v25, %v753_v23  ;;  %v808_v28 = vpop.f32.mrb[7].mxu0 }
 0x25e   : > { %s1674_s0 = scalar_lea.vmem [#allocation6], %s1592_s30  ;;  %s1799_s25 = sand.u32 1, %s1342_s18  }
 0x25f   : > { %s1682_s29 = scalar_lea.sflag [#allocation3], %s1799_s25  ;;  %s1256_s22 = scalar_lea.vmem %s1624_s24, 256 }
 0x260   : > { %p1257_p1 = scmp.ne.s32.totalorder %s1624_s24, %s1256_s22  ;;  %s1356_s30 = smov [#allocation2]  }
 0x261   : > { %s1260_s13 = sshll.u32 %s1356_s30, 4  ;;  %s1261_s13 = int_to_ptr.vmem [resolvable:$false] %s1260_s13 }
 0x262   : > { %p1258_p2 = pnand %p1257_p1, %p1458_p5  ;;  %s1262_s16 = scalar_lea.vmem %s1261_s13, 512 }
 0x263   : > { %p1263_p4 = scmp.lt.s32.totalorder %s1624_s24, %s1261_s13  ;;  %p1264_p7 = scmp.lt.s32.totalorder %s1262_s16, %s1256_s22 }
 0x264   : > { %p1259_p3 = pneg %p1258_p2 }
 0x265   : > { %p1265_p8 = por %p1264_p7, %p1263_p4 }
 0x267   : > { %p1266_p9 = pnand %p1265_p8, %p1259_p3 }
 0x269   : > { %1269 = shalt.err (!%p1266_p9)
}
 0x26a   : > { %s1270_s12 = scalar_lea.hbm %s1636_s14, 256  ;;  %s1274_s30 = scalar_lea.hbm %s1781_s9, 512 }
 0x26b   : > { %p1271_p10 = scmp.ne.s32.totalorder %s1636_s14, %s1270_s12  ;;  %p1275_p13 = scmp.lt.u32.totalorder %s1636_s14, %s1781_s9 }
 0x26c   : > { %p1276_p0 = scmp.lt.u32.totalorder %s1274_s30, %s1270_s12  ;;  %p1278_p2 = scmp.lt.u32.totalorder %s1270_s12, %s1636_s14 }
 0x26d   : > { %p1272_p11 = pnand %p1271_p10, %p1458_p5 }
 0x26e   : > { %p1277_p1 = por %p1276_p0, %p1275_p13 }
 0x26f   : > { %p1273_p12 = pneg %p1272_p11 }
 0x270   : > { %p1279_p3 = por %p1278_p2, %p1277_p1 }
 0x272   : > { %p1280_p4 = pnand %p1279_p3, %p1273_p12 }
 0x274   : > { %1283 = shalt.err (!%p1280_p4)
}
 0x275   : > { %1160 = dma.vmem_to_hbm [thread:$0]  (%p1458_p5), %s1624_s24, 256, %s1636_s14, %s1682_s29, %s1354_s2, %s1354_s2, %s1355_s4   ;;  %v1117_v29 = vpack.c.bf16 %v806_v24, %v806_v24  ;;  %v809_v30 = vadd.f32 %v808_v28, %v1604_v5  ;;  %v1120_v31 = vpack.c.bf16 %v817_v27, %v817_v27 }
 0x276   : > { %883 = vst.msk [vmem:[%s1674_s0 + $0x8] sm:$0xf] %vm840_vm2, %v1119_v26  ;;  %s1800_s21 = sshll.u32 %s1674_s0, 4  ;;  %s1722_s12 = scalar_lea.hbm %s1783_s11, %s1602_s15  ;;  %s1714_s21 = int_to_ptr.vmem [resolvable:$true] %s1800_s21 }
 0x277   : > { %881 = vst.msk [vmem:[%s1674_s0] sm:$0xf] %vm840_vm2, %v1117_v29  ;;  %v1118_v32 = vpack.c.bf16 %v809_v30, %v809_v30  ;;  %884 = vst.msk [vmem:[%s1674_s0 + $0xc] sm:$0xf] %vm840_vm2, %v1120_v31  ;;  %s1284_s14 = scalar_lea.vmem %s1714_s21, 256  ;;  %s1357_s24 = smov [#allocation6]  }
 0x278   : > { %p1285_p7 = scmp.ne.s32.totalorder %s1714_s21, %s1284_s14  ;;  %s1288_s29 = sshll.u32 %s1357_s24, 4  ;;  %s1289_s29 = int_to_ptr.vmem [resolvable:$false] %s1288_s29 }
 0x279   : > { %882 = vst.msk [vmem:[%s1674_s0 + $0x4] sm:$0xf] %vm840_vm2, %v1118_v32  ;;  %s1290_s3 = scalar_lea.vmem %s1289_s29, 512  ;;  %p1291_p10 = scmp.lt.s32.totalorder %s1714_s21, %s1289_s29 }
 0x27a   : > { %p1286_p8 = pnand %p1285_p7, %p1458_p5  ;;  %p1292_p11 = scmp.lt.s32.totalorder %s1290_s3, %s1284_s14 }
 0x27c   : > { %p1287_p9 = pneg %p1286_p8  ;;  %p1293_p12 = por %p1292_p11, %p1291_p10 }
 0x27e   : > { %p1294_p13 = pnand %p1293_p12, %p1287_p9 }
 0x280   : > { %1297 = shalt.err (!%p1294_p13)
}
 0x281   : > { %s1298_s15 = scalar_lea.hbm %s1722_s12, 256  ;;  %s1302_s30 = scalar_lea.hbm %s1783_s11, 512 }
 0x282   : > { %p1299_p0 = scmp.ne.s32.totalorder %s1722_s12, %s1298_s15  ;;  %p1303_p3 = scmp.lt.u32.totalorder %s1722_s12, %s1783_s11 }
 0x283   : > { %p1304_p4 = scmp.lt.u32.totalorder %s1302_s30, %s1298_s15  ;;  %p1306_p8 = scmp.lt.u32.totalorder %s1298_s15, %s1722_s12 }
 0x284   : > { %p1300_p1 = pnand %p1299_p0, %p1458_p5 }
 0x285   : > { %p1305_p7 = por %p1304_p4, %p1303_p3 }
 0x286   : > { %p1301_p2 = pneg %p1300_p1 }
 0x287   : > { %p1307_p9 = por %p1306_p8, %p1305_p7 }
 0x289   : > { %p1308_p10 = pnand %p1307_p9, %p1301_p2 }
 0x28b   : > { %1311 = shalt.err (!%p1308_p10)
}
 0x28c   : > { %1162 = dma.vmem_to_hbm [thread:$0]  (%p1458_p5), %s1714_s21, 256, %s1722_s12, %s1644_s1, %s1354_s2, %s1354_s2, %s1355_s4  }
 0x28d PF: > { %p1176_p11 = scmp.ge.s32.totalorder %s1350_s20, 2  ;;  %s956_s16 = sand.u32 1, %s1338_s17  }
 0x28e   : > { %s957_s14 = scalar_lea.sflag [#allocation3], %s956_s16 }
 0x28f   : > { %p1167_p12 = pnand %p1176_p11, %p1462_p6 }
 0x291   : > { %1329 = dma.done.wait (!%p1167_p12), %s957_s14, 256  }
 0x292   : > { %1331 = vsyncadd (!%p1167_p12), %s957_s14, 4294967040  ;;  %s1801_s27 = sadd.s32 4294967294, %s1350_s20  }
 0x293   : > { %s965_s24 = sand.u32 1, %s1801_s27  }
 0x294   : > { %s966_s29 = scalar_lea.sflag [#allocation5], %s965_s24 }
 0x295   : > { %1333 = dma.done.wait (!%p1167_p12), %s966_s29, 512  }
 0x296   : > { %1335 = vsyncadd (!%p1167_p12), %s966_s29, 4294966784  ;;  %p25_p5 = scmp.ge.s32.totalorder %s1443_s23, 4   ;;  %s1802_s17 = smov %s1342_s18 }
 0x297   : > { %s1803_s18 = smov %s1346_s19  ;;  %s1804_s19 = smov %s1456_s26 }
 0x298   : > { %s1805_s20 = smov %s1443_s23  ;;  %27 = sbr.rel (!%p25_p5) target bundleno = 11 (0xb), region = 123 }
 0x29f   :  { %980 = vsyncpa [#allocation3], 1 }
 0x2a0   :  { %982 = vsyncpa [#allocation3 + $0x1], 1 }
 0x2a1   :  { %983 = vsyncpa [#allocation5], 1 }
 0x2a2   :  { %985 = vsyncpa [#allocation5 + $0x1], 1 }

</bundles_post_ra>
